<compile_context>
chip_gen: v7x
topology: tpu7x:2x2x1
jax: 0.10.0
libtpu: 0.0.40
codegen_flags: <defaults>
</compile_context>

<pallas_src>
import math
import functools

import jax
import jax.numpy as jnp
from jax import lax
from jax.experimental import pallas as pl
from jax.experimental.pallas import tpu as pltpu


def _round_up(x: int, m: int) -> int:
    return (x + m - 1) // m * m


def _vmem_capacity_bytes() -> int:
    """Physical VMEM per TensorCore (128 MiB v5e/v6e, 64 MiB v7x); conservative fallback."""
    try:
        info = pltpu.get_tpu_info()
        cap = int(getattr(info, "vmem_capacity_bytes", 0) or 0)
        if cap > 0:
            return cap
    except Exception:
        pass
    return 64 * 1024 * 1024


def _pick_token_block(n: int, d: int, out_itemsize: int, target_bytes: int) -> int:
    """Token rows per grid step, sized so the (TB, D) output slab is ~target_bytes."""
    tb = max(8, target_bytes // max(1, d * out_itemsize))
    tb = min(tb, _round_up(n, 8))      # don't pad tiny inputs up to a huge block
    tb = min(tb, 4096)                 # keep one-hot intermediates / per-step DMA counts sane
    return _round_up(tb, 8)


# ---------------------------------------------------------------------------
# Path 1: VMEM-resident table, one-hot MXU gather (small vocabularies).
# ---------------------------------------------------------------------------

def _onehot_kernel(ids_ref, table_ref, out_ref, *, scale):
    # ids_ref:   VMEM int32 (TB, 1)  -- token ids for this block (sublane-dense column)
    # table_ref: VMEM       (V, D)   -- full table, resident (constant index_map, 1 buffer)
    # out_ref:   VMEM       (TB, D)  -- gathered (scaled) rows, lane-dense
    ids = ids_ref[...]                                   # (TB, 1)
    tb = out_ref.shape[0]
    vocab = table_ref.shape[0]

    # Canonical orientation: one-hot is (TB, V) so the matmul contracts the LHS minor dim
    # (no XLU transpose of the LHS tile).
    v_iota = lax.broadcasted_iota(jnp.int32, (tb, vocab), 1)
    onehot = (v_iota == ids).astype(table_ref.dtype)     # (TB, V), exact 0/1

    if table_ref.dtype == jnp.float32:
        # Exact f32 row selection needs HIGHEST (~3-6 MXU passes). Serve a bf16 table when
        # bit-exact f32 rows are not required -- selection stays exact at default precision.
        precision = lax.Precision.HIGHEST
    else:
        precision = None

    rows = jnp.dot(onehot, table_ref[...],
                   preferred_element_type=jnp.float32, precision=precision)   # (TB, D) f32
    if scale != 1.0:
        rows = rows * scale
    out_ref[...] = rows.astype(out_ref.dtype)


def _onehot_vmem_bytes(vocab, d, tb, table_itemsize, out_itemsize):
    """Conservative VMEM estimate for the resident-table one-hot path."""
    table = vocab * d * table_itemsize                     # single-buffered resident table
    ids = 2 * tb * 128 * 4                                 # (TB,1) i32 blocks, lane-padded, 2 bufs
    outs = 2 * tb * d * out_itemsize                       # double-buffered output blocks
    inter = tb * vocab * 4 + tb * vocab * table_itemsize   # iota + one-hot intermediate
    inter += tb * d * 4 + tb * d * out_itemsize            # f32 accumulator + cast result
    return table + ids + outs + inter


def _embedding_onehot(flat_ids, emb_table, scale, tb, vmem_limit_bytes):
    vocab, d = emb_table.shape
    n = flat_ids.shape[0]
    n_pad = _round_up(n, tb)
    n_blocks = n_pad // tb

    # Pad with id 0 (valid row); padded rows are sliced off below.
    ids_col = jnp.zeros((n_pad, 1), jnp.int32).at[:n, 0].set(flat_ids)

    out = pl.pallas_call(
        functools.partial(_onehot_kernel, scale=float(scale)),
        out_shape=jax.ShapeDtypeStruct((n_pad, d), emb_table.dtype),
        grid_spec=pltpu.PrefetchScalarGridSpec(
            num_scalar_prefetch=0,
            grid=(n_blocks,),
            in_specs=[
                pl.BlockSpec((tb, 1), lambda i: (i, 0)),
                # Constant index_map -> DMA'd once; single-buffered (a second pipeline buffer
                # for a constant block is pure VMEM waste).
                pl.BlockSpec((vocab, d), lambda i: (0, 0),
                             pipeline_mode=pl.Buffered(1)),
            ],
            out_specs=pl.BlockSpec((tb, d), lambda i: (i, 0)),
        ),
        compiler_params=pltpu.CompilerParams(
            # Disjoint output blocks -> token axis can shard across TCs (v7x megacore).
            # Note: with n_blocks < 2 the second core simply idles.
            dimension_semantics=("parallel",),
            vmem_limit_bytes=vmem_limit_bytes,
        ),
    )(ids_col, emb_table)
    return out[:n]


# ---------------------------------------------------------------------------
# Path 2: HBM table, per-row DMA gather driven by scalar-prefetched token ids
# (arbitrarily large vocabularies; the table never has to fit in VMEM).
# ---------------------------------------------------------------------------

def _gather_kernel(ids_ref, table_hbm, out_ref, row_buf, sem, *, scale):
    # ids_ref:   SMEM int32 (n_pad,)  -- all token ids (scalar-prefetched)
    # table_hbm: HBM        (V, D)    -- raw table ref (memory_space=pl.ANY)
    # out_ref:   VMEM       (TB, D)   -- output slab for this block
    # row_buf:   VMEM       (TB, D)   -- DMA landing buffer
    # sem:       DMA semaphore        -- shared; every row copy has identical size
    tb = out_ref.shape[0]
    base = pl.program_id(0) * tb

    # Issue all TB row DMAs before waiting on any (maximum overlap).
    @pl.loop(0, tb)
    def _start(t):
        tok = ids_ref[base + t]
        pltpu.make_async_copy(table_hbm.at[pl.ds(tok, 1)],
                              row_buf.at[pl.ds(t, 1)], sem).start()

    @pl.loop(0, tb)
    def _wait(_):
        # Same-shape descriptor: each wait retires exactly one row copy.
        pltpu.make_async_copy(table_hbm.at[pl.ds(0, 1)],
                              row_buf.at[pl.ds(0, 1)], sem).wait()

    rows = row_buf[...]
    if scale != 1.0:
        rows = rows.astype(jnp.float32) * scale
    out_ref[...] = rows.astype(out_ref.dtype)


def _embedding_gather(flat_ids, emb_table, scale, tb, vmem_limit_bytes):
    vocab, d = emb_table.shape
    n = flat_ids.shape[0]
    n_pad = _round_up(n, tb)
    n_blocks = n_pad // tb

    ids_padded = jnp.zeros((n_pad,), jnp.int32).at[:n].set(flat_ids)

    out = pl.pallas_call(
        functools.partial(_gather_kernel, scale=float(scale)),
        out_shape=jax.ShapeDtypeStruct((n_pad, d), emb_table.dtype),
        grid_spec=pltpu.PrefetchScalarGridSpec(
            num_scalar_prefetch=1,                            # token ids -> SMEM before the grid
            grid=(n_blocks,),
            in_specs=[pl.BlockSpec(memory_space=pl.ANY)],     # table stays in HBM
            out_specs=pl.BlockSpec((tb, d), lambda i, ids: (i, 0)),
            scratch_shapes=[
                pltpu.VMEM((tb, d), emb_table.dtype),
                pltpu.SemaphoreType.DMA(()),
            ],
        ),
        compiler_params=pltpu.CompilerParams(
            dimension_semantics=("parallel",),
            vmem_limit_bytes=vmem_limit_bytes,
        ),
    )(ids_padded, emb_table)
    return out[:n]


# ---------------------------------------------------------------------------
# Public wrapper
# ---------------------------------------------------------------------------

def embedding_forward(token_ids, emb_table, scale, *, path="auto",
                      onehot_vocab_limit=1024,
                      target_out_block_bytes=1 << 20):
    """out[..., :] = emb_table[token_ids[...], :] * scale  (PyTorch Embedding forward)."""
    orig_shape = token_ids.shape
    vocab, d = emb_table.shape

    flat_ids = token_ids.reshape(-1).astype(jnp.int32)
    n = flat_ids.shape[0]

    table_itemsize = jnp.dtype(emb_table.dtype).itemsize
    out_itemsize = table_itemsize

    # Generation-aware VMEM budgets: ~108 MiB on v5e/v6e (128 MiB), ~54 MiB on v7x (64 MiB/TC).
    cap = _vmem_capacity_bytes()
    vmem_limit_bytes = min(int(cap * 0.85), 120 * 1024 * 1024)
    residency_budget = vmem_limit_bytes - (4 << 20)

    tb = _pick_token_block(n, d, out_itemsize, target_out_block_bytes)

    # One-hot path only while the matmul stays cheap (V small) and the table fits VMEM;
    # otherwise (production vocabularies) use the HBM DMA-gather path.
    use_onehot = path == "onehot" or (path == "auto" and vocab <= onehot_vocab_limit)
    if use_onehot:
        tb_oh = tb
        while tb_oh > 8 and _onehot_vmem_bytes(vocab, d, tb_oh,
                                               table_itemsize, out_itemsize) > residency_budget:
            tb_oh = _round_up(max(8, tb_oh // 2), 8)
        fits = _onehot_vmem_bytes(vocab, d, tb_oh,
                                  table_itemsize, out_itemsize) <= residency_budget
        if fits:
            out_flat = _embedding_onehot(flat_ids, emb_table, scale, tb_oh, vmem_limit_bytes)
            return out_flat.reshape(*orig_shape, d)
        if path == "onehot":
            raise ValueError("embedding table too large for the VMEM-resident one-hot path")

    out_flat = _embedding_gather(flat_ids, emb_table, scale, tb, vmem_limit_bytes)
    return out_flat.reshape(*orig_shape, d)


def init_embedding_table(key, vocab_size, embedding_dim, pad_id):
    # nn.init.normal_(weight, mean=0, std=embedding_dim ** -0.5); weight[pad_id] = 0
    w = jax.random.normal(key, (vocab_size, embedding_dim), dtype=jnp.float32)
    w = w * (embedding_dim ** -0.5)
    w = w.at[pad_id].set(0.0)
    return w


if __name__ == "__main__":
    # Small synthetic config consistent with the module.
    vocab_size = 48            # len(dictionary)
    embedding_dim = 128        # lane-dense embedding rows
    pad_id = 0                 # dictionary.pad_id()
    scale_embedding = True
    scale = math.sqrt(embedding_dim) if scale_embedding else 1.0

    B, S = 2, 8

    key = jax.random.PRNGKey(0)
    k_w, k_tok = jax.random.split(key)

    emb_table = init_embedding_table(k_w, vocab_size, embedding_dim, pad_id)
    token_ids = jax.random.randint(k_tok, (B, S), 0, vocab_size, dtype=jnp.int32)
    token_ids = token_ids.at[0, 0].set(pad_id)   # exercise the padding row

    ref = jnp.take(emb_table, token_ids, axis=0) * scale

    # Path 1: VMEM-resident one-hot MXU gather (auto-selected for this tiny vocab).
    out = jax.block_until_ready(embedding_forward(token_ids, emb_table, scale))
    assert out.shape == (B, S, embedding_dim)
    assert jnp.allclose(out, ref, atol=1e-5, rtol=1e-5), "onehot path mismatch vs reference"
    assert jnp.allclose(out[0, 0], 0.0), "pad row must be zero"

    # Path 2: HBM DMA-gather path (what large vocabularies use), forced for coverage.
    out_g = jax.block_until_ready(
        embedding_forward(token_ids, emb_table, scale, path="gather"))
    assert out_g.shape == (B, S, embedding_dim)
    assert jnp.allclose(out_g, ref, atol=1e-5, rtol=1e-5), "gather path mismatch vs reference"
    assert jnp.allclose(out_g[0, 0], 0.0), "pad row must be zero (gather path)"

    print("KERNEL_OK")
</pallas_src>

<mosaic_0001>
module attributes {stable_mosaic.version = 11 : i64} {
  func.func @_onehot_kernel(%arg0: i32, %arg1: memref<16x1xi32, #tpu.memory_space<vmem>>, %arg2: memref<48x128xf32, #tpu.memory_space<vmem>>, %arg3: memref<16x128xf32, #tpu.memory_space<vmem>>) attributes {dimension_semantics = [#tpu.dimension_semantics<parallel>], iteration_bounds = array<i64: 1>, scalar_prefetch = 0 : i64, scratch_operands = 0 : i64, tpu.core_type = #tpu.core_type<tc>, window_params = [{transform_indices = @transform_0, window_bounds = array<i64: 16, 1>}, {pipeline_mode = #tpu.pipeline_mode<synchronous>, transform_indices = @transform_1, window_bounds = array<i64: 48, 128>}, {transform_indices = @transform_2, window_bounds = array<i64: 16, 128>}]} {
    %c0 = arith.constant 0 : index
    %c0_0 = arith.constant 0 : index
    %0 = vector.load %arg1[%c0, %c0_0] : memref<16x1xi32, #tpu.memory_space<vmem>>, vector<16x1xi32>
    %1 = tpu.iota {dimensions = array<i32: 1>} : vector<16x48xi32>
    %2 = vector.broadcast %0 : vector<16x1xi32> to vector<16x48xi32>
    %3 = arith.cmpi eq, %1, %2 : vector<16x48xi32>
    %4 = arith.extui %3 : vector<16x48xi1> to vector<16x48xi32>
    %5 = arith.sitofp %4 : vector<16x48xi32> to vector<16x48xf32>
    %c0_1 = arith.constant 0 : index
    %c0_2 = arith.constant 0 : index
    %6 = vector.load %arg2[%c0_1, %c0_2] : memref<48x128xf32, #tpu.memory_space<vmem>>, vector<48x128xf32>
    %cst = arith.constant dense<0.000000e+00> : vector<16x128xf32>
    %7 = tpu.matmul %5, %6, %cst {dimension_numbers = #tpu.dot_dimension_numbers<[1], [0], [0], [1], [0, 0, 1, 1], [], []>, precision = #tpu.contract_precision<fp32>} : vector<16x48xf32>, vector<48x128xf32>, vector<16x128xf32> -> vector<16x128xf32>
    %cst_3 = arith.constant 11.3137083 : f32
    %8 = vector.broadcast %cst_3 : f32 to vector<16x128xf32>
    %9 = arith.mulf %7, %8 : vector<16x128xf32>
    %c0_4 = arith.constant 0 : index
    %c0_5 = arith.constant 0 : index
    %10 = vector.load %arg3[%c0_4, %c0_5] : memref<16x128xf32, #tpu.memory_space<vmem>>, vector<16x128xf32>
    tpu.vector_store %arg3[%c0_4, %c0_5], %9 {strides = array<i32>} : memref<16x128xf32, #tpu.memory_space<vmem>>, vector<16x128xf32>,
    return
  }
  func.func @transform_0(%arg0: i32) -> (i32, i32) {
    %c0_i32 = arith.constant 0 : i32
    %c0_i32_0 = arith.constant 0 : i32
    return %arg0, %c0_i32 : i32, i32
  }
  func.func @transform_1(%arg0: i32) -> (i32, i32) {
    %c0_i32 = arith.constant 0 : i32
    %c0_i32_0 = arith.constant 0 : i32
    %c0_i32_1 = arith.constant 0 : i32
    return %c0_i32, %c0_i32_0 : i32, i32
  }
  func.func @transform_2(%arg0: i32) -> (i32, i32) {
    %c0_i32 = arith.constant 0 : i32
    %c0_i32_0 = arith.constant 0 : i32
    return %arg0, %c0_i32 : i32, i32
  }
}

</mosaic_0001>

<bundles_post_ra>
// kernel: tpu_custom_call.1
= control target key start
LH: loop header
LB: loop body
LE: loop exit
PB: predicated region body
PF: predicated region fallthrough
CT: control target
= control target key end

     0   :  { %7 = vsyncpa [#allocation3], 0  ;;  %s1002_s0 = inlined_call_operand.vmem [shape: s32[16,1], index: 0, kind: input, shape index: {}]   ;;  %s1003_s1 = inlined_call_operand.hbm [shape: f32[48,128], index: 1, kind: input, shape index: {}]   ;;  %s1004_s2 = inlined_call_operand.hbm [shape: f32[16,128], index: 2, kind: output, shape index: {}]  }
   0x1   :  { %8 = vsyncpa [#allocation4], 0  ;;  %s913_s9 = smov [#allocation2]   ;;  %s865_s13 = scalar_lea.hbm %s1003_s1, 768 }
   0x2   :  { %s16_s10 = sshll.u32 %s913_s9, 4  ;;  %p866_p0 = scmp.ne.s32.totalorder %s1003_s1, %s865_s13  ;;  %s17_s10 = int_to_ptr.vmem [resolvable:$true] %s16_s10 }
   0x3   :  { %p869_p1 = scmp.lt.u32.totalorder %s865_s13, %s1003_s1 }
   0x5   :  { %p871_p2 = pnand %p869_p1, %p866_p0 }
   0x7   :  { %874 = shalt.err (!%p871_p2)
}
   0x8   :  { %s875_s18 = scalar_lea.vmem %s17_s10, 768  ;;  %p880_p4 = scmp.lt.s32.totalorder %s17_s10, %s17_s10 }
   0x9   :  { %p876_p3 = scmp.ne.s32.totalorder %s17_s10, %s875_s18  ;;  %p881_p5 = scmp.lt.s32.totalorder %s875_s18, %s875_s18 }
   0xb   :  { %p882_p6 = por %p881_p5, %p880_p4 }
   0xd   :  { %p883_p7 = pnand %p882_p6, %p876_p3 }
   0xf   :  { %886 = shalt.err (!%p883_p7)
}
  0x10   :  { %s914_s19 = smov 128   ;;  %s915_s20 = smov 8  }
  0x11   :  { %22 = dma.hbm_to_vmem [thread:$0]  %s1003_s1, 768, %s17_s10, [#allocation3], %s914_s19, %s914_s19, %s915_s20  }
  0x12   :  { %909 = dma.done.wait [#allocation3], 768  }
  0x13   :  { %910 = vsyncadd [#allocation3], 4294966528  ;;  %v916_v0 = vmov 0   ;;  %v26_v1 = vld [vmem:[%s1002_s0] sm:$0xff]  ;;  %v43_v3 = vld [vmem:[#allocation2 + $0x8] sm:$0xff]  ;;  %v28_v51 = vlaneseq  ;;  %vm48_vm0 = vcmask 392192  }
  0x14   :  { %864 = vset.pattern.permute.xlu0 %v916_v0  ;;  %v42_v2 = vld [vmem:[#allocation2] sm:$0xff]  ;;  %v44_v5 = vld [vmem:[#allocation2 + $0x10] sm:$0xff]  ;;  %v45_v6 = vld [vmem:[#allocation2 + $0x18] sm:$0xff]  ;;  %v59_v8 = vand.u32 4294901760, %v43_v3  ;;  %v917_v54 = vmov 0.0  }
  0x15   :  { %31 = vperm.xlu0 %864, %v26_v1   ;;  %v56_v4 = vand.u32 4294901760, %v42_v2  ;;  %v27_v7 = vld [vmem:[%s1002_s0 + $0x8] sm:$0xff]  ;;  %v62_v9 = vand.u32 4294901760, %v44_v5  ;;  %v65_v10 = vand.u32 4294901760, %v45_v6  ;;  %v46_v11 = vld [vmem:[#allocation2 + $0x20] sm:$0xff]  ;;  %v29_v52 = vand.u32 127, %v28_v51 }
  0x16   :  { %v47_v12 = vld [vmem:[#allocation2 + $0x28] sm:$0xff]  ;;  %v68_v15 = vand.u32 4294901760, %v46_v11  ;;  %v155_v18 = vsub.f32 %v43_v3, %v59_v8  ;;  %s918_s0 = smov [#allocation5]  }
  0x17   :  { %v955_v13 = vpack.c.bf16 %v59_v8, %v56_v4  ;;  %v957_v14 = vpack.c.bf16 %v65_v10, %v62_v9  ;;  %v71_v16 = vand.u32 4294901760, %v47_v12  ;;  %v148_v17 = vsub.f32 %v42_v2, %v56_v4  ;;  %s618_s1 = sshll.u32 %s918_s0, 4  ;;  %s619_s1 = int_to_ptr.vmem [resolvable:$true] %s618_s1 }
  0x18   :  { %v156_v20 = vand.u32 4294901760, %v155_v18  ;;  %v162_v24 = vsub.f32 %v44_v5, %v62_v9  ;;  %v169_v25 = vsub.f32 %v45_v6, %v65_v10  ;;  %v176_v35 = vsub.f32 %v46_v11, %v68_v15  ;;  %s887_s27 = scalar_lea.vmem %s619_s1, 256  ;;  %p892_p9 = scmp.lt.s32.totalorder %s619_s1, %s619_s1 }
  0x19   :  { %34 = vperm.xlu0 %864, %v27_v7   ;;  %813 = vmatprep.subr.bf16.mxu0 %v955_v13  ;;  %v149_v19 = vand.u32 4294901760, %v148_v17  ;;  %v965_v21 = vpack.c.bf16 %v71_v16, %v68_v15  ;;  %v183_v36 = vsub.f32 %v47_v12, %v71_v16  ;;  %v800_v48 = vpack.c.bf16 %v155_v18, %v148_v17  ;;  %p888_p8 = scmp.ne.s32.totalorder %s619_s1, %s887_s27  ;;  %p893_p10 = scmp.lt.s32.totalorder %s887_s27, %s887_s27 }
  0x1a   :  { %777 = vmatprep.subr.bf16.mxu1 %v955_v13  ;;  %815 = vmatpush3.bf16.msra.mxu0 %v955_v13  ;;  %v157_v23 = vsub.f32 %v155_v18, %v156_v20  ;;  %v163_v29 = vand.u32 4294901760, %v162_v24  ;;  %v170_v30 = vand.u32 4294901760, %v169_v25  ;;  %v177_v39 = vand.u32 4294901760, %v176_v35 }
  0x1b   :  { %779 = vmatpush3.bf16.msra.mxu1 %v955_v13  ;;  %817 = vmatprep.subr.bf16.mxu0 %v957_v14  ;;  %v150_v22 = vsub.f32 %v148_v17, %v149_v19  ;;  %v824_v26 = vpack.c.bf16 %v156_v20, %v149_v19  ;;  %v184_v40 = vand.u32 4294901760, %v183_v36  ;;  %v804_v49 = vpack.c.bf16 %v169_v25, %v162_v24  ;;  %p894_p11 = por %p893_p10, %p892_p9 }
  0x1c   :  { %781 = vmatprep.subr.bf16.mxu1 %v957_v14  ;;  %v158_v28 = vand.u32 4294901760, %v157_v23  ;;  %v828_v32 = vpack.c.bf16 %v170_v30, %v163_v29  ;;  %v164_v33 = vsub.f32 %v162_v24, %v163_v29  ;;  %v171_v34 = vsub.f32 %v169_v25, %v170_v30 }
  0x1d   :  { %v151_v27 = vand.u32 4294901760, %v150_v22  ;;  %v832_v42 = vpack.c.bf16 %v184_v40, %v177_v39  ;;  %v178_v43 = vsub.f32 %v176_v35, %v177_v39  ;;  %v185_v44 = vsub.f32 %v183_v36, %v184_v40  ;;  %p895_p12 = pnand %p894_p11, %p888_p8 }
  0x1e   :  { %819 = vmatpush3.bf16.msra.mxu0 %v957_v14  ;;  %v165_v37 = vand.u32 4294901760, %v164_v33  ;;  %v172_v38 = vand.u32 4294901760, %v171_v34  ;;  %v808_v50 = vpack.c.bf16 %v183_v36, %v176_v35 }
  0x1f   :  { %783 = vmatpush3.bf16.msra.mxu1 %v957_v14  ;;  %821 = vmatprep.subr.bf16.mxu0 %v965_v21  ;;  %v788_v31 = vpack.c.bf16 %v158_v28, %v151_v27  ;;  %v179_v45 = vand.u32 4294901760, %v178_v43  ;;  %v186_v46 = vand.u32 4294901760, %v185_v44 }
  0x20   :  { %785 = vmatprep.subr.bf16.mxu1 %v965_v21  ;;  %v792_v41 = vpack.c.bf16 %v172_v38, %v165_v37 }
  0x21   :  { %v796_v47 = vpack.c.bf16 %v186_v46, %v179_v45 }
  0x22   :  { %823 = vmatpush3.bf16.msra.mxu0 %v965_v21 }
  0x23   :  { %787 = vmatpush3.bf16.msra.mxu1 %v965_v21  ;;  %825 = vmatprep.subr.bf16.mxu0 %v824_v26 }
  0x24   :  { %789 = vmatprep.subr.bf16.mxu1 %v788_v31 }
  0x94   :  { %v32_v53 = vpop.permute.xlu0 %31 }
  0x95   :  { %vm36_vm1 = vcmp.eq.s32.totalorder %v29_v52, %v32_v53 }
  0x96   :  { %v630_v55 = vsel %vm36_vm1, 1.0, %v917_v54 }
  0x97   :  { %v50_v56 = vsel %vm48_vm0, %v630_v55, 0 }
  0x98   :  { %v127_v57 = vsub.f32 %v50_v56, %v50_v56  ;;  %v35_v58 = vpop.permute.xlu0 %34 }
  0x99   :  { %vm37_vm2 = vcmp.eq.s32.totalorder %v29_v52, %v35_v58 }
  0x9a   :  { %v631_v59 = vsel %vm37_vm2, 1.0, %v917_v54  ;;  %v128_v60 = vand.u32 4294901760, %v127_v57 }
  0x9b   :  { %v53_v61 = vsel %vm48_vm0, %v631_v59, 0 }
  0x9c   :  { %v137_v62 = vsub.f32 %v53_v61, %v53_v61  ;;  %743 = vmatprep.mubr.f32.mxu0 %v128_v60  ;;  %v129_v63 = vsub.f32 %v127_v57, %v128_v60 }
  0x9e   :  { %v130_v0 = vand.u32 4294901760, %v129_v63  ;;  %v138_v1 = vand.u32 4294901760, %v137_v62 }
  0xa0   :  { %698 = vmatprep.mubr.f32.mxu1 %v130_v0  ;;  %744 = vmatmul.mubr.f32.vlgmr.msra.gmra.mrb[0].mxu0 %v138_v1  ;;  %v139_v2 = vsub.f32 %v137_v62, %v138_v1 }
  0xa1   :  { %827 = vmatpush3.bf16.msra.mxu0 %v824_v26  ;;  %758 = vmatprep.mubr.msk.f32.mxu0 %vm48_vm0, %v630_v55 }
  0xa2   :  { %829 = vmatprep.subr.bf16.mxu0 %v828_v32  ;;  %v140_v3 = vand.u32 4294901760, %v139_v2 }
  0xa4   :  { %699 = vmatmul.mubr.f32.vlgmr.msra.gmra.mrb[0].mxu1 %v140_v3 }
  0xa5   :  { %791 = vmatpush3.bf16.msra.mxu1 %v788_v31  ;;  %831 = vmatpush3.bf16.msra.mxu0 %v828_v32 }
  0xa6   :  { %713 = vmatprep.mubr.msk.f32.mxu1 %vm48_vm0, %v630_v55  ;;  %793 = vmatprep.subr.bf16.mxu1 %v792_v41 }
  0xa7   :  { %833 = vmatprep.subr.bf16.mxu0 %v832_v42 }
  0xa9   :  { %795 = vmatpush3.bf16.msra.mxu1 %v792_v41  ;;  %835 = vmatpush3.bf16.msra.mxu0 %v832_v42 }
  0xaa   :  { %797 = vmatprep.subr.bf16.mxu1 %v796_v47  ;;  %837 = vmatprep.subr.bf16.mxu0 %v955_v13 }
  0xac   :  { %759 = vmatmul.mubr.msk.f32.vlgmr.msra.gmra.mrb[0].mxu0 %vm48_vm0, %v631_v59 }
  0xad   :  { %799 = vmatpush3.bf16.msra.mxu1 %v796_v47  ;;  %839 = vmatpush3.bf16.msra.mxu0 %v955_v13 }
  0xae   :  { %773 = vmatprep.mubr.msk.f32.mxu0 %vm48_vm0, %v630_v55  ;;  %801 = vmatprep.subr.bf16.mxu1 %v800_v48 }
  0xaf   :  { %841 = vmatprep.subr.bf16.mxu0 %v957_v14 }
  0xb0   :  { %714 = vmatmul.mubr.msk.f32.vlgmr.msra.gmra.mrb[0].mxu1 %vm48_vm0, %v631_v59 }
  0xb1   :  { %803 = vmatpush3.bf16.msra.mxu1 %v800_v48  ;;  %728 = vmatprep.mubr.f32.mxu1 %v127_v57 }
  0xb2   :  { %843 = vmatpush3.bf16.msra.mxu0 %v957_v14  ;;  %805 = vmatprep.subr.bf16.mxu1 %v804_v49 }
  0xb3   :  { %845 = vmatprep.subr.bf16.mxu0 %v965_v21 }
  0xb5   :  { %807 = vmatpush3.bf16.msra.mxu1 %v804_v49 }
  0xb6   :  { %847 = vmatpush3.bf16.msra.mxu0 %v965_v21  ;;  %809 = vmatprep.subr.bf16.mxu1 %v808_v50 }
  0xb9   :  { %774 = vmatmul.mubr.msk.f32.vlgmr.msra.gmra.mrb[0].mxu0 %vm48_vm0, %v631_v59  ;;  %811 = vmatpush3.bf16.msra.mxu1 %v808_v50 }
  0xbc   :  { %729 = vmatmul.mubr.f32.vlgmr.msra.gmra.mrb[0].mxu1 %v137_v62 }
 0x18c   :  { %v775_v4 = vpop.f32.mrb[0].mxu0 }
 0x18d   :  { %v599_v5 = vpop.f32.mrb[1].mxu0 }
 0x18f   :  { %v730_v6 = vpop.f32.mrb[0].mxu1 }
 0x190   :  { %v848_v7 = vadd.f32 %v775_v4, %v730_v6  ;;  %v333_v8 = vpop.f32.mrb[1].mxu1 }
 0x191   :  { %v849_v9 = vadd.f32 %v599_v5, %v333_v8 }
 0x192   :  { %v610_v10 = vmul.f32 11.313708, %v848_v7 }
 0x193   :  { %v609_v11 = vmul.f32 11.313708, %v849_v9 }
 0x194   :  { %612 = vst [vmem:[#allocation5 + $0x8] sm:$0xff] %v610_v10 }
 0x195   :  { %611 = vst [vmem:[#allocation5] sm:$0xff] %v609_v11 }
 0x196   :  { %898 = shalt.err (!%p895_p12)
}
 0x197   :  { %s899_s30 = scalar_lea.hbm %s1004_s2, 256 }
 0x198   :  { %p900_p13 = scmp.ne.s32.totalorder %s1004_s2, %s899_s30  ;;  %p903_p0 = scmp.lt.u32.totalorder %s899_s30, %s1004_s2 }
 0x19a   :  { %p905_p1 = pnand %p903_p0, %p900_p13 }
 0x19c   :  { %908 = shalt.err (!%p905_p1)
}
 0x19d   :  { %624 = dma.vmem_to_hbm [thread:$0]  %s619_s1, 256, %s1004_s2, [#allocation4], %s914_s19, %s914_s19, %s915_s20  }
 0x19e   :  { %911 = dma.done.wait [#allocation4], 256  }
 0x19f   :  { %912 = vsyncadd [#allocation4], 4294967040 }
 0x1a0   :  { %628 = vsyncpa [#allocation3], 1 }
 0x1a1   :  { %629 = vsyncpa [#allocation4], 1 }

</bundles_post_ra>
